<compile_context>
chip_gen: v6e
topology: v6e:2x2x1
jax: 0.10.0
libtpu: 0.0.40
codegen_flags: <defaults>
</compile_context>

<pallas_src>
import functools

import jax
import jax.numpy as jnp
from jax.experimental import pallas as pl
from jax.experimental.pallas import tpu as pltpu


_VMEM_LIMIT = 48 * 1024 * 1024   # headroom against v7x's 64 MiB physical VMEM


# ----------------------------------------------------------------------------
# small helpers
# ----------------------------------------------------------------------------
def _largest_divisor_leq(n, target):
    t = max(1, min(n, target))
    while n % t:
        t -= 1
    return t


def _choose_cout_tile(cout, target=256):
    """Full width when small; otherwise a lane-dense multiple of 128."""
    if cout <= target:
        return cout
    if target >= 256 and cout % 256 == 0:
        return 256
    if target >= 128 and cout % 128 == 0:
        return 128
    return cout


def _auto_row_tile(out_h, out_w, target_rows=1024, cap=64):
    """Output-row tile: aim for ~target_rows MXU rows per step, divide out_h."""
    tgt = max(8, min(cap, -(-target_rows // max(out_w, 1))))
    return _largest_divisor_leq(out_h, tgt)


def _silu(x_f32, approx):
    # x * sigmoid(x); exp and the reciprocal both go to the EUP so the epilogue
    # stays off the VALU slots.  Exact reciprocal on the f32-operand path.
    return x_f32 * pl.reciprocal(1.0 + jnp.exp(-x_f32), approx=approx)


# ----------------------------------------------------------------------------
# Pallas kernels
# ----------------------------------------------------------------------------
def _pw_kernel(x_ref, w_ref, b_ref, o_ref, *, act):
    """1x1 conv == matmul over channels, fused with folded-BN bias + SiLU.

    x_ref: (tm, Cin)  w_ref: (Cin, tn)  b_ref: (1, tn) f32  o_ref: (tm, tn)
    """
    acc = jnp.dot(x_ref[...], w_ref[...], preferred_element_type=jnp.float32)
    acc = acc + b_ref[...]
    if act:
        acc = _silu(acc, approx=(x_ref.dtype != jnp.float32))
    o_ref[...] = acc.astype(o_ref.dtype)


def _convk_kernel(xp_ref, w_ref, b_ref, o_ref, *, k, d, th, wo, cin, pack, act):
    """k x k (stride-1) conv on one halo'd row slab, fused bias + SiLU.

    xp_ref: (1, th + (k-1)*d, >= wo + (k-1)*d, cin)  padded-input slab (halo rows)
    w_ref : (k*k*cin, tn)    taps flattened into the contraction dim
    b_ref : (1, tn) f32
    o_ref : (1, th, wo, tn)
    """
    tn = o_ref.shape[-1]
    if pack:
        # im2col over the k x k window only, inside the kernel: one MXU pass
        # with K = k*k*cin (fills the systolic array for small channel counts).
        cols = []
        for dy in range(k):
            for dx in range(k):
                win = xp_ref[0, dy * d:dy * d + th, dx * d:dx * d + wo, :]
                cols.append(win.reshape(th * wo, cin))
        patch = jnp.concatenate(cols, axis=-1)                 # (th*wo, k*k*cin)
        acc = jnp.dot(patch, w_ref[...], preferred_element_type=jnp.float32)
    else:
        acc = jnp.zeros((th * wo, tn), jnp.float32)
        for dy in range(k):
            for dx in range(k):
                # shifted window comes straight from the (ref-sliced) load.
                win = xp_ref[0, dy * d:dy * d + th, dx * d:dx * d + wo, :]
                wt = w_ref[(dy * k + dx) * cin:(dy * k + dx + 1) * cin, :]
                acc = acc + jnp.dot(win.reshape(th * wo, cin), wt,
                                    preferred_element_type=jnp.float32)
    acc = acc + b_ref[...]
    if act:
        acc = _silu(acc, approx=(xp_ref.dtype != jnp.float32))
    o_ref[...] = acc.reshape(1, th, wo, tn).astype(o_ref.dtype)


# ----------------------------------------------------------------------------
# Kernel wrappers
# ----------------------------------------------------------------------------
def pointwise_conv_bn_act(x_nhwc, w, b, *, act=True, compute_dtype=jnp.bfloat16,
                          tm_target=512, tn_target=256):
    """x: (N,H,W,Cin), w: (Cin,Cout), b: (Cout,) -> (N,H,W,Cout)."""
    N, H, W, Cin = x_nhwc.shape
    Cout = w.shape[-1]
    out_dtype = x_nhwc.dtype
    M = N * H * W
    xm = x_nhwc.reshape(M, Cin).astype(compute_dtype)
    wm = w.astype(compute_dtype)
    bm = b.reshape(1, Cout).astype(jnp.float32)
    # 512-row tiles amortize per-grid-step overhead; tm_target is a multiple of
    # 8 so a tiled (non-full) block shape stays (8,128)-legal.
    tm = M if M <= tm_target else tm_target
    tn = _choose_cout_tile(Cout, tn_target)
    grid = (pl.cdiv(M, tm), pl.cdiv(Cout, tn))
    out = pl.pallas_call(
        functools.partial(_pw_kernel, act=act),
        out_shape=jax.ShapeDtypeStruct((M, Cout), out_dtype),
        grid=grid,
        in_specs=[
            pl.BlockSpec((tm, Cin), lambda i, j: (i, 0)),
            pl.BlockSpec((Cin, tn), lambda i, j: (0, j)),
            pl.BlockSpec((1, tn), lambda i, j: (0, j)),
        ],
        out_specs=pl.BlockSpec((tm, tn), lambda i, j: (i, j)),
        compiler_params=pltpu.CompilerParams(
            dimension_semantics=("parallel", "parallel"),
            vmem_limit_bytes=_VMEM_LIMIT),
    )(xm, wm, bm)
    return out.reshape(N, H, W, Cout)


def conv_kxk_bn_act(x_nhwc, w_hwio, b, *, k, d=1, act=True,
                    compute_dtype=jnp.bfloat16, th_target=None, tn_target=256):
    """x: (N,H,W,Cin), w: (k,k,Cin,Cout), b: (Cout,) -> (N,H,W,Cout). stride 1."""
    N, H, W, Cin = x_nhwc.shape
    Cout = w_hwio.shape[-1]
    assert w_hwio.shape[:3] == (k, k, Cin)
    assert k % 2 == 1, "even kernel sizes not supported"  # TODO(synk): even-k autopad
    out_dtype = x_nhwc.dtype
    p = d * (k // 2)                                  # ultralytics autopad
    # single pre-pad (reused by every grid step); border masking in-kernel is a
    # possible further optimization.
    xp = jnp.pad(x_nhwc, ((0, 0), (p, p), (p, p), (0, 0))).astype(compute_dtype)
    Wp = W + 2 * p
    th = _largest_divisor_leq(H, th_target) if th_target else _auto_row_tile(H, W)
    th_in = th + 2 * p                                # input slab rows (halo)
    tn = _choose_cout_tile(Cout, tn_target)
    w2 = w_hwio.reshape(k * k * Cin, Cout).astype(compute_dtype)
    bm = b.reshape(1, Cout).astype(jnp.float32)
    pack_taps = (k * k * Cin) <= 512                  # pack taps into K when small

    kernel = functools.partial(_convk_kernel, k=k, d=d, th=th, wo=W, cin=Cin,
                               pack=pack_taps, act=act)
    grid = (N, H // th, pl.cdiv(Cout, tn))
    return pl.pallas_call(
        kernel,
        out_shape=jax.ShapeDtypeStruct((N, H, W, Cout), out_dtype),
        grid=grid,
        in_specs=[
            # halo'd row slab of the pre-padded input: element-offset indexing
            # on the H axis (row block r starts at padded row r*th).
            pl.BlockSpec((1, pl.Element(th_in), Wp, Cin),
                         lambda n, r, c: (n, r * th, 0, 0)),
            pl.BlockSpec((k * k * Cin, tn), lambda n, r, c: (0, c)),
            pl.BlockSpec((1, tn), lambda n, r, c: (0, c)),
        ],
        out_specs=pl.BlockSpec((1, th, W, tn), lambda n, r, c: (n, r, 0, c)),
        compiler_params=pltpu.CompilerParams(
            dimension_semantics=("parallel", "parallel", "parallel"),
            vmem_limit_bytes=_VMEM_LIMIT),
    )(xp, w2, bm)


def conv_kxk_strided_bn_act(x_nhwc, w_hwio, b, *, k, s, act=True,
                            compute_dtype=jnp.bfloat16, th_target=None,
                            tn_target=256):
    """Stride-s (s>1, d=1) k x k conv.  Space-to-depth in the wrapper turns it
    into a stride-1 conv with ke = ceil(k/s) taps over s*s*Cin channels, so the
    validated stride-1 kernel is reused and no discarded outputs are computed.
    """
    N, H, W, Cin = x_nhwc.shape
    Cout = w_hwio.shape[-1]
    assert w_hwio.shape[:3] == (k, k, Cin)
    out_dtype = x_nhwc.dtype
    p = k // 2                                        # autopad with d == 1
    Ho = (H + 2 * p - k) // s + 1
    Wo = (W + 2 * p - k) // s + 1
    Hs = -(-(H + 2 * p) // s)                         # ceil of padded extent / s
    Ws = -(-(W + 2 * p) // s)
    # pad so the padded extent is a multiple of s, then space-to-depth
    # (phase-major channels).  xph[n, r, q, (py*s+px)*Cin + c] = xp[n, s*r+py, s*q+px, c]
    xp = jnp.pad(x_nhwc,
                 ((0, 0), (p, Hs * s - H - p), (p, Ws * s - W - p), (0, 0)))
    xph = (xp.reshape(N, Hs, s, Ws, s, Cin)
             .transpose(0, 1, 3, 2, 4, 5)
             .reshape(N, Hs, Ws, s * s * Cin)
             .astype(compute_dtype))
    ke = (k - 1) // s + 1                             # effective stride-1 kernel size
    cin_eff = s * s * Cin
    # weight rearranged to match the phase-major channel layout; taps whose
    # phase index would exceed k are zero.
    wz = jnp.zeros((ke * s, ke * s, Cin, Cout), w_hwio.dtype).at[:k, :k].set(w_hwio)
    w_eff = (wz.reshape(ke, s, ke, s, Cin, Cout)
               .transpose(0, 2, 1, 3, 4, 5)
               .reshape(ke * ke * cin_eff, Cout)
               .astype(compute_dtype))
    bm = b.reshape(1, Cout).astype(jnp.float32)

    th = _largest_divisor_leq(Ho, th_target) if th_target else _auto_row_tile(Ho, Wo)
    th_in = th + (ke - 1)                             # halo rows in phase space
    tn = _choose_cout_tile(Cout, tn_target)
    pack_taps = (ke * ke * cin_eff) <= 512

    kernel = functools.partial(_convk_kernel, k=ke, d=1, th=th, wo=Wo,
                               cin=cin_eff, pack=pack_taps, act=act)
    grid = (N, Ho // th, pl.cdiv(Cout, tn))
    return pl.pallas_call(
        kernel,
        out_shape=jax.ShapeDtypeStruct((N, Ho, Wo, Cout), out_dtype),
        grid=grid,
        in_specs=[
            pl.BlockSpec((1, pl.Element(th_in), Ws, cin_eff),
                         lambda n, r, c: (n, r * th, 0, 0)),
            pl.BlockSpec((ke * ke * cin_eff, tn), lambda n, r, c: (0, c)),
            pl.BlockSpec((1, tn), lambda n, r, c: (0, c)),
        ],
        out_specs=pl.BlockSpec((1, th, Wo, tn), lambda n, r, c: (n, r, 0, c)),
        compiler_params=pltpu.CompilerParams(
            dimension_semantics=("parallel", "parallel", "parallel"),
            vmem_limit_bytes=_VMEM_LIMIT),
    )(xph, w_eff, bm)


# ----------------------------------------------------------------------------
# Conv.forward equivalent (NCHW in / NCHW out)
# ----------------------------------------------------------------------------
def conv_forward(x_nchw, params, *, k=1, s=1, d=1, g=1, act=True,
                 compute_dtype=jnp.bfloat16, th_target=None):
    """SiLU(BN(Conv2d(x, bias=False))) with BN folded; padding = autopad."""
    # TODO(synk): groups g > 1, training-mode BatchNorm statistics and act
    # modules other than SiLU / identity are not implemented.
    assert g == 1, "groups > 1 not supported"
    x = jnp.transpose(x_nchw, (0, 2, 3, 1))                  # NCHW -> NHWC
    w, b = params["w"], params["b"]                          # w: (k,k,Cin,Cout)
    if k == 1:
        if s > 1:
            x = x[:, ::s, ::s, :]      # 1x1 conv with stride == subsample + matmul
        y = pointwise_conv_bn_act(x, w.reshape(w.shape[-2], w.shape[-1]), b,
                                  act=act, compute_dtype=compute_dtype)
    elif s == 1:
        y = conv_kxk_bn_act(x, w, b, k=k, d=d, act=act,
                            compute_dtype=compute_dtype, th_target=th_target)
    elif d == 1:
        y = conv_kxk_strided_bn_act(x, w, b, k=k, s=s, act=act,
                                    compute_dtype=compute_dtype,
                                    th_target=th_target)
    else:
        # TODO(synk): dedicated kernel for s>1 combined with dilation>1; fall
        # back to the stride-1 output subsampled at ::s (correct, extra compute).
        y = conv_kxk_bn_act(x, w, b, k=k, d=d, act=act,
                            compute_dtype=compute_dtype, th_target=th_target)
        y = y[:, ::s, ::s, :]
    return jnp.transpose(y, (0, 3, 1, 2))                    # NHWC -> NCHW


# ----------------------------------------------------------------------------
# Deterministic parameter construction (BN folded into conv)
# ----------------------------------------------------------------------------
def make_conv_params(key, cin, cout, k):
    """Conv2d(bias=False) weight (HWIO) + BatchNorm2d folded -> {'w','b'}."""
    k1, k2, k3, k4, k5 = jax.random.split(key, 5)
    w = jax.random.normal(k1, (k, k, cin, cout), jnp.float32) * 0.1
    gamma = jax.random.uniform(k2, (cout,), minval=0.5, maxval=1.5)
    beta = jax.random.normal(k3, (cout,), jnp.float32) * 0.1
    r_mean = jax.random.normal(k4, (cout,), jnp.float32) * 0.1
    r_var = jax.random.uniform(k5, (cout,), minval=0.5, maxval=1.5)
    eps = 1e-5
    scale = gamma / jnp.sqrt(r_var + eps)                    # per-output-channel
    return {"w": w * scale, "b": beta - r_mean * scale}


# ----------------------------------------------------------------------------
# Pure-JAX reference (for correctness checks)
# ----------------------------------------------------------------------------
def conv_reference(x_nchw, params, *, k=1, s=1, d=1, act=True):
    x = jnp.transpose(x_nchw, (0, 2, 3, 1)).astype(jnp.float32)
    w = params["w"].astype(jnp.float32)
    b = params["b"].astype(jnp.float32)
    p = d * (k // 2)
    y = jax.lax.conv_general_dilated(
        x, w, (s, s), [(p, p), (p, p)], rhs_dilation=(d, d),
        dimension_numbers=("NHWC", "HWIO", "NHWC")) + b
    if act:
        y = y * jax.nn.sigmoid(y)
    return jnp.transpose(y, (0, 3, 1, 2))


# ----------------------------------------------------------------------------
if __name__ == "__main__":
    key = jax.random.PRNGKey(0)
    kx, kp1, kp3 = jax.random.split(key, 3)

    N, in_c, H, W = 2, 4, 16, 16
    out_c = 8
    x = jax.random.normal(kx, (N, in_c, H, W), jnp.float32)   # NCHW like PyTorch

    # --- Conv(in_c, out_c): module defaults k=1, s=1, SiLU (f32 compute) ------
    p1 = make_conv_params(kp1, in_c, out_c, 1)
    fwd1 = jax.jit(functools.partial(conv_forward, k=1, compute_dtype=jnp.float32))
    out1 = fwd1(x, p1)
    jax.block_until_ready(out1)
    ref1 = conv_reference(x, p1, k=1)
    assert out1.shape == (N, out_c, H, W), out1.shape
    assert bool(jnp.allclose(out1, ref1, atol=1e-3, rtol=1e-3)), \
        float(jnp.max(jnp.abs(out1 - ref1)))

    # --- Conv(in_c, out_c, k=1, s=2): subsample + matmul ----------------------
    fwd1s2 = jax.jit(functools.partial(conv_forward, k=1, s=2,
                                       compute_dtype=jnp.float32))
    out1s = fwd1s2(x, p1)
    jax.block_until_ready(out1s)
    ref1s = conv_reference(x, p1, k=1, s=2)
    assert out1s.shape == (N, out_c, H // 2, W // 2), out1s.shape
    assert bool(jnp.allclose(out1s, ref1s, atol=1e-3, rtol=1e-3)), \
        float(jnp.max(jnp.abs(out1s - ref1s)))

    # --- Conv(in_c, out_c, k=3): tiled halo'd 3x3 kernel (f32 compute) --------
    p3 = make_conv_params(kp3, in_c, out_c, 3)
    fwd3 = jax.jit(functools.partial(conv_forward, k=3,
                                     compute_dtype=jnp.float32, th_target=8))
    out3 = fwd3(x, p3)                    # th=8 -> two row blocks, halo exercised
    jax.block_until_ready(out3)
    ref3 = conv_reference(x, p3, k=3)
    assert out3.shape == (N, out_c, H, W), out3.shape
    assert bool(jnp.allclose(out3, ref3, atol=1e-3, rtol=1e-3)), \
        float(jnp.max(jnp.abs(out3 - ref3)))

    # --- same Conv, bf16 matmul operands + f32 accumulation (perf config) -----
    fwd3_bf16 = jax.jit(functools.partial(conv_forward, k=3,
                                          compute_dtype=jnp.bfloat16, th_target=8))
    out3b = fwd3_bf16(x, p3)
    jax.block_until_ready(out3b)
    assert bool(jnp.allclose(out3b, ref3, atol=5e-2, rtol=5e-2)), \
        float(jnp.max(jnp.abs(out3b - ref3)))

    # --- Conv(in_c, out_c, k=3, s=2): space-to-depth strided kernel -----------
    fwd3s2 = jax.jit(functools.partial(conv_forward, k=3, s=2,
                                       compute_dtype=jnp.float32))
    out3s = fwd3s2(x, p3)
    jax.block_until_ready(out3s)
    ref3s = conv_reference(x, p3, k=3, s=2)
    assert out3s.shape == (N, out_c, H // 2, W // 2), out3s.shape
    assert bool(jnp.allclose(out3s, ref3s, atol=1e-3, rtol=1e-3)), \
        float(jnp.max(jnp.abs(out3s - ref3s)))

    # --- strided + bf16 operands ----------------------------------------------
    fwd3s2_bf16 = jax.jit(functools.partial(conv_forward, k=3, s=2,
                                            compute_dtype=jnp.bfloat16))
    out3sb = fwd3s2_bf16(x, p3)
    jax.block_until_ready(out3sb)
    assert bool(jnp.allclose(out3sb, ref3s, atol=5e-2, rtol=5e-2)), \
        float(jnp.max(jnp.abs(out3sb - ref3s)))

    print("KERNEL_OK")
</pallas_src>

<mosaic_0001>
module attributes {stable_mosaic.version = 11 : i64} {
  func.func @_pw_kernel(%arg0: i32, %arg1: i32, %arg2: memref<512x4xf32, #tpu.memory_space<vmem>>, %arg3: memref<4x8xf32, #tpu.memory_space<vmem>>, %arg4: memref<1x8xf32, #tpu.memory_space<vmem>>, %arg5: memref<512x8xf32, #tpu.memory_space<vmem>>) attributes {dimension_semantics = [#tpu.dimension_semantics<parallel>, #tpu.dimension_semantics<parallel>], iteration_bounds = array<i64: 1, 1>, scalar_prefetch = 0 : i64, scratch_operands = 0 : i64, tpu.core_type = #tpu.core_type<tc>, window_params = [{transform_indices = @transform_0, window_bounds = array<i64: 512, 4>}, {transform_indices = @transform_1, window_bounds = array<i64: 4, 8>}, {transform_indices = @transform_2, window_bounds = array<i64: 1, 8>}, {transform_indices = @transform_3, window_bounds = array<i64: 512, 8>}]} {
    %c0 = arith.constant 0 : index
    %c0_0 = arith.constant 0 : index
    %0 = vector.load %arg2[%c0, %c0_0] : memref<512x4xf32, #tpu.memory_space<vmem>>, vector<512x4xf32>
    %c0_1 = arith.constant 0 : index
    %c0_2 = arith.constant 0 : index
    %1 = vector.load %arg3[%c0_1, %c0_2] : memref<4x8xf32, #tpu.memory_space<vmem>>, vector<4x8xf32>
    %cst = arith.constant dense<0.000000e+00> : vector<512x8xf32>
    %2 = tpu.matmul %0, %1, %cst {dimension_numbers = #tpu.dot_dimension_numbers<[1], [0], [0], [1], [0, 0, 1, 1], [], []>} : vector<512x4xf32>, vector<4x8xf32>, vector<512x8xf32> -> vector<512x8xf32>
    %c0_3 = arith.constant 0 : index
    %c0_4 = arith.constant 0 : index
    %3 = vector.load %arg4[%c0_3, %c0_4] : memref<1x8xf32, #tpu.memory_space<vmem>>, vector<1x8xf32>
    %4 = vector.broadcast %3 : vector<1x8xf32> to vector<512x8xf32>
    %5 = arith.addf %2, %4 : vector<512x8xf32>
    %cst_5 = arith.constant 0.000000e+00 : f32
    %6 = vector.broadcast %cst_5 : f32 to vector<512x8xf32>
    %7 = arith.subf %6, %5 : vector<512x8xf32>
    %8 = math.exp %7 : vector<512x8xf32>
    %cst_6 = arith.constant 1.000000e+00 : f32
    %9 = vector.broadcast %cst_6 : f32 to vector<512x8xf32>
    %10 = arith.addf %9, %8 : vector<512x8xf32>
    %11 = tpu.reciprocal %10 : vector<512x8xf32> -> vector<512x8xf32>
    %12 = arith.mulf %5, %11 : vector<512x8xf32>
    %c0_7 = arith.constant 0 : index
    %c0_8 = arith.constant 0 : index
    %13 = vector.load %arg5[%c0_7, %c0_8] : memref<512x8xf32, #tpu.memory_space<vmem>>, vector<512x8xf32>
    tpu.vector_store %arg5[%c0_7, %c0_8], %12 {strides = array<i32>} : memref<512x8xf32, #tpu.memory_space<vmem>>, vector<512x8xf32>,
    return
  }
  func.func @transform_0(%arg0: i32, %arg1: i32) -> (i32, i32) {
    %c0_i32 = arith.constant 0 : i32
    %c0_i32_0 = arith.constant 0 : i32
    return %arg0, %c0_i32 : i32, i32
  }
  func.func @transform_1(%arg0: i32, %arg1: i32) -> (i32, i32) {
    %c0_i32 = arith.constant 0 : i32
    %c0_i32_0 = arith.constant 0 : i32
    return %c0_i32, %arg1 : i32, i32
  }
  func.func @transform_2(%arg0: i32, %arg1: i32) -> (i32, i32) {
    %c0_i32 = arith.constant 0 : i32
    %c0_i32_0 = arith.constant 0 : i32
    return %c0_i32, %arg1 : i32, i32
  }
  func.func @transform_3(%arg0: i32, %arg1: i32) -> (i32, i32) {
    %c0_i32 = arith.constant 0 : i32
    return %arg0, %arg1 : i32, i32
  }
}

</mosaic_0001>

<bundles_post_ra>
// kernel: conv_forward.1
= control target key start
LH: loop header
LB: loop body
LE: loop exit
PB: predicated region body
PF: predicated region fallthrough
CT: control target
= control target key end

     0   :  { %vm279_vm0 = vcmask 1043456   ;;  %vm86_vm1 = vcmask 31744   ;;  %vm1052_vm2 = vcmask 64512   ;;  %s2480_s1 = inlined_call_operand.vmem [shape: f32[4,8], index: 1, kind: input, shape index: {}]   ;;  %s2481_s0 = inlined_call_operand.vmem [shape: f32[512,4], index: 0, kind: input, shape index: {}]   ;;  %s2482_s2 = inlined_call_operand.vmem [shape: f32[1,8], index: 2, kind: input, shape index: {}]   ;;  %s2483_s3 = inlined_call_operand.vmem [shape: f32[512,8], index: 3, kind: output, shape index: {}]  }
   0x1   :  { %v78_v0 = vld [vmem:[%s2480_s1] sm:$0xf]  ;;  %v15_v3 = vld [vmem:[%s2481_s0 + $0x8] sm:$0xff]  ;;  %v16_v5 = vld [vmem:[%s2481_s0 + $0x10] sm:$0xff] }
   0x2   :  { %v14_v1 = vld [vmem:[%s2481_s0] sm:$0xff]  ;;  %1252 = vmatprep.subr.msk.mxu0 %vm279_vm0, %v78_v0  ;;  %1350 = vmatprep.subr.msk.mxu1 %vm279_vm0, %v78_v0  ;;  %v47_v4 = vld [vmem:[%s2481_s0 + $0x108] sm:$0xff]  ;;  %v48_v6 = vld [vmem:[%s2481_s0 + $0x110] sm:$0xff] }
   0x3   :  { %v46_v2 = vld [vmem:[%s2481_s0 + $0x100] sm:$0xff]  ;;  %1253 = vmatpush3.msk.msra.mxu0 %vm279_vm0, %v78_v0  ;;  %1351 = vmatpush3.msk.msra.mxu1 %vm279_vm0, %v78_v0  ;;  %v17_v7 = vld [vmem:[%s2481_s0 + $0x18] sm:$0xff]  ;;  %v19_v11 = vld [vmem:[%s2481_s0 + $0x28] sm:$0xff] }
   0x4   :  { %1254 = vmatprep.mubr.msk.f32.mxu0 %vm86_vm1, %v14_v1  ;;  %1302 = vmatprep.mubr.msk.f32.mxu1 %vm86_vm1, %v46_v2  ;;  %v49_v8 = vld [vmem:[%s2481_s0 + $0x118] sm:$0xff]  ;;  %v18_v9 = vld [vmem:[%s2481_s0 + $0x20] sm:$0xff]  ;;  %v51_v12 = vld [vmem:[%s2481_s0 + $0x128] sm:$0xff] }
   0x5   :  { %1255 = vmatmul.mubr.msk.f32.vlgmr.msra.gmra.mxu0 %vm86_vm1, %v15_v3  ;;  %1303 = vmatmul.mubr.msk.f32.vlgmr.msra.gmra.mxu1 %vm86_vm1, %v47_v4  ;;  %v50_v10 = vld [vmem:[%s2481_s0 + $0x120] sm:$0xff]  ;;  %v20_v13 = vld [vmem:[%s2481_s0 + $0x30] sm:$0xff]  ;;  %v21_v15 = vld [vmem:[%s2481_s0 + $0x38] sm:$0xff] }
   0x6   :  { %1257 = vmatprep.mubr.msk.f32.mxu0 %vm86_vm1, %v16_v5  ;;  %1305 = vmatprep.mubr.msk.f32.mxu1 %vm86_vm1, %v48_v6  ;;  %v52_v14 = vld [vmem:[%s2481_s0 + $0x130] sm:$0xff]  ;;  %v53_v16 = vld [vmem:[%s2481_s0 + $0x138] sm:$0xff]  ;;  %v22_v17 = vld [vmem:[%s2481_s0 + $0x40] sm:$0xff] }
   0x7   :  { %v54_v18 = vld [vmem:[%s2481_s0 + $0x140] sm:$0xff]  ;;  %v23_v19 = vld [vmem:[%s2481_s0 + $0x48] sm:$0xff]  ;;  %v24_v21 = vld [vmem:[%s2481_s0 + $0x50] sm:$0xff] }
   0x8   :  { %v55_v20 = vld [vmem:[%s2481_s0 + $0x148] sm:$0xff]  ;;  %v56_v22 = vld [vmem:[%s2481_s0 + $0x150] sm:$0xff]  ;;  %v25_v23 = vld [vmem:[%s2481_s0 + $0x58] sm:$0xff] }
   0x9   :  { %1258 = vmatmul.mubr.msk.f32.gmra.mxu0 %vm86_vm1, %v17_v7  ;;  %1306 = vmatmul.mubr.msk.f32.gmra.mxu1 %vm86_vm1, %v49_v8  ;;  %v57_v24 = vld [vmem:[%s2481_s0 + $0x158] sm:$0xff]  ;;  %v26_v25 = vld [vmem:[%s2481_s0 + $0x60] sm:$0xff]  ;;  %v27_v27 = vld [vmem:[%s2481_s0 + $0x68] sm:$0xff] }
   0xa   :  { %1260 = vmatprep.mubr.msk.f32.mxu0 %vm86_vm1, %v18_v9  ;;  %1308 = vmatprep.mubr.msk.f32.mxu1 %vm86_vm1, %v50_v10  ;;  %v58_v26 = vld [vmem:[%s2481_s0 + $0x160] sm:$0xff]  ;;  %v59_v28 = vld [vmem:[%s2481_s0 + $0x168] sm:$0xff]  ;;  %v28_v29 = vld [vmem:[%s2481_s0 + $0x70] sm:$0xff] }
   0xb   :  { %v60_v30 = vld [vmem:[%s2481_s0 + $0x170] sm:$0xff]  ;;  %v29_v31 = vld [vmem:[%s2481_s0 + $0x78] sm:$0xff]  ;;  %v30_v33 = vld [vmem:[%s2481_s0 + $0x80] sm:$0xff] }
   0xc   :  { %v61_v32 = vld [vmem:[%s2481_s0 + $0x178] sm:$0xff]  ;;  %v62_v34 = vld [vmem:[%s2481_s0 + $0x180] sm:$0xff]  ;;  %v31_v35 = vld [vmem:[%s2481_s0 + $0x88] sm:$0xff] }
   0xd   :  { %1261 = vmatmul.mubr.msk.f32.gmra.mxu0 %vm86_vm1, %v19_v11  ;;  %1309 = vmatmul.mubr.msk.f32.gmra.mxu1 %vm86_vm1, %v51_v12  ;;  %v63_v36 = vld [vmem:[%s2481_s0 + $0x188] sm:$0xff]  ;;  %v32_v37 = vld [vmem:[%s2481_s0 + $0x90] sm:$0xff]  ;;  %v33_v39 = vld [vmem:[%s2481_s0 + $0x98] sm:$0xff] }
   0xe   :  { %1263 = vmatprep.mubr.msk.f32.mxu0 %vm86_vm1, %v20_v13  ;;  %1311 = vmatprep.mubr.msk.f32.mxu1 %vm86_vm1, %v52_v14  ;;  %v64_v38 = vld [vmem:[%s2481_s0 + $0x190] sm:$0xff]  ;;  %v65_v40 = vld [vmem:[%s2481_s0 + $0x198] sm:$0xff]  ;;  %v34_v41 = vld [vmem:[%s2481_s0 + $0xa0] sm:$0xff] }
   0xf   :  { %v66_v42 = vld [vmem:[%s2481_s0 + $0x1a0] sm:$0xff]  ;;  %v35_v43 = vld [vmem:[%s2481_s0 + $0xa8] sm:$0xff]  ;;  %v36_v45 = vld [vmem:[%s2481_s0 + $0xb0] sm:$0xff] }
  0x10   :  { %v67_v44 = vld [vmem:[%s2481_s0 + $0x1a8] sm:$0xff]  ;;  %v68_v46 = vld [vmem:[%s2481_s0 + $0x1b0] sm:$0xff]  ;;  %v37_v47 = vld [vmem:[%s2481_s0 + $0xb8] sm:$0xff] }
  0x11   :  { %1264 = vmatmul.mubr.msk.f32.gmra.mxu0 %vm86_vm1, %v21_v15  ;;  %1312 = vmatmul.mubr.msk.f32.gmra.mxu1 %vm86_vm1, %v53_v16  ;;  %v69_v48 = vld [vmem:[%s2481_s0 + $0x1b8] sm:$0xff]  ;;  %v38_v49 = vld [vmem:[%s2481_s0 + $0xc0] sm:$0xff]  ;;  %v39_v51 = vld [vmem:[%s2481_s0 + $0xc8] sm:$0xff] }
  0x12   :  { %1266 = vmatprep.mubr.msk.f32.mxu0 %vm86_vm1, %v22_v17  ;;  %1314 = vmatprep.mubr.msk.f32.mxu1 %vm86_vm1, %v54_v18  ;;  %v70_v50 = vld [vmem:[%s2481_s0 + $0x1c0] sm:$0xff]  ;;  %v71_v52 = vld [vmem:[%s2481_s0 + $0x1c8] sm:$0xff]  ;;  %v40_v53 = vld [vmem:[%s2481_s0 + $0xd0] sm:$0xff] }
  0x13   :  { %v72_v54 = vld [vmem:[%s2481_s0 + $0x1d0] sm:$0xff]  ;;  %v41_v55 = vld [vmem:[%s2481_s0 + $0xd8] sm:$0xff]  ;;  %v42_v57 = vld [vmem:[%s2481_s0 + $0xe0] sm:$0xff] }
  0x14   :  { %v73_v56 = vld [vmem:[%s2481_s0 + $0x1d8] sm:$0xff]  ;;  %v74_v58 = vld [vmem:[%s2481_s0 + $0x1e0] sm:$0xff]  ;;  %v43_v59 = vld [vmem:[%s2481_s0 + $0xe8] sm:$0xff] }
  0x15   :  { %1267 = vmatmul.mubr.msk.f32.gmra.mxu0 %vm86_vm1, %v23_v19  ;;  %1315 = vmatmul.mubr.msk.f32.gmra.mxu1 %vm86_vm1, %v55_v20  ;;  %v75_v60 = vld [vmem:[%s2481_s0 + $0x1e8] sm:$0xff]  ;;  %v44_v61 = vld [vmem:[%s2481_s0 + $0xf0] sm:$0xff]  ;;  %v45_v63 = vld [vmem:[%s2481_s0 + $0xf8] sm:$0xff] }
  0x16   :  { %1269 = vmatprep.mubr.msk.f32.mxu0 %vm86_vm1, %v24_v21  ;;  %1317 = vmatprep.mubr.msk.f32.mxu1 %vm86_vm1, %v56_v22  ;;  %v76_v62 = vld [vmem:[%s2481_s0 + $0x1f0] sm:$0xff]  ;;  %v77_v0 = vld [vmem:[%s2481_s0 + $0x1f8] sm:$0xff]  ;;  %v1891_v1 = vld [vmem:[%s2482_s2] ss:$0 sm:$0xff] }
  0x19   :  { %1270 = vmatmul.mubr.msk.f32.gmra.mxu0 %vm86_vm1, %v25_v23  ;;  %1318 = vmatmul.mubr.msk.f32.gmra.mxu1 %vm86_vm1, %v57_v24 }
  0x1a   :  { %1272 = vmatprep.mubr.msk.f32.mxu0 %vm86_vm1, %v26_v25  ;;  %1320 = vmatprep.mubr.msk.f32.mxu1 %vm86_vm1, %v58_v26 }
  0x1d   :  { %1273 = vmatmul.mubr.msk.f32.gmra.mxu0 %vm86_vm1, %v27_v27  ;;  %1321 = vmatmul.mubr.msk.f32.gmra.mxu1 %vm86_vm1, %v59_v28 }
  0x1e   :  { %1275 = vmatprep.mubr.msk.f32.mxu0 %vm86_vm1, %v28_v29  ;;  %1323 = vmatprep.mubr.msk.f32.mxu1 %vm86_vm1, %v60_v30 }
  0x21   :  { %1276 = vmatmul.mubr.msk.f32.gmra.mxu0 %vm86_vm1, %v29_v31  ;;  %1324 = vmatmul.mubr.msk.f32.gmra.mxu1 %vm86_vm1, %v61_v32 }
  0x22   :  { %1278 = vmatprep.mubr.msk.f32.mxu0 %vm86_vm1, %v30_v33  ;;  %1326 = vmatprep.mubr.msk.f32.mxu1 %vm86_vm1, %v62_v34 }
  0x25   :  { %1279 = vmatmul.mubr.msk.f32.gmra.mxu0 %vm86_vm1, %v31_v35  ;;  %1327 = vmatmul.mubr.msk.f32.gmra.mxu1 %vm86_vm1, %v63_v36 }
  0x26   :  { %1281 = vmatprep.mubr.msk.f32.mxu0 %vm86_vm1, %v32_v37  ;;  %1329 = vmatprep.mubr.msk.f32.mxu1 %vm86_vm1, %v64_v38 }
  0x29   :  { %1282 = vmatmul.mubr.msk.f32.gmra.mxu0 %vm86_vm1, %v33_v39  ;;  %1330 = vmatmul.mubr.msk.f32.gmra.mxu1 %vm86_vm1, %v65_v40 }
  0x2a   :  { %1284 = vmatprep.mubr.msk.f32.mxu0 %vm86_vm1, %v34_v41  ;;  %1332 = vmatprep.mubr.msk.f32.mxu1 %vm86_vm1, %v66_v42 }
  0x2d   :  { %1285 = vmatmul.mubr.msk.f32.gmra.mxu0 %vm86_vm1, %v35_v43  ;;  %1333 = vmatmul.mubr.msk.f32.gmra.mxu1 %vm86_vm1, %v67_v44 }
  0x2e   :  { %1287 = vmatprep.mubr.msk.f32.mxu0 %vm86_vm1, %v36_v45  ;;  %1335 = vmatprep.mubr.msk.f32.mxu1 %vm86_vm1, %v68_v46 }
  0x31   :  { %1288 = vmatmul.mubr.msk.f32.gmra.mxu0 %vm86_vm1, %v37_v47  ;;  %1336 = vmatmul.mubr.msk.f32.gmra.mxu1 %vm86_vm1, %v69_v48 }
  0x32   :  { %1290 = vmatprep.mubr.msk.f32.mxu0 %vm86_vm1, %v38_v49  ;;  %1338 = vmatprep.mubr.msk.f32.mxu1 %vm86_vm1, %v70_v50 }
  0x35   :  { %1291 = vmatmul.mubr.msk.f32.gmra.mxu0 %vm86_vm1, %v39_v51  ;;  %1339 = vmatmul.mubr.msk.f32.gmra.mxu1 %vm86_vm1, %v71_v52 }
  0x36   :  { %1293 = vmatprep.mubr.msk.f32.mxu0 %vm86_vm1, %v40_v53  ;;  %1341 = vmatprep.mubr.msk.f32.mxu1 %vm86_vm1, %v72_v54 }
  0x39   :  { %1294 = vmatmul.mubr.msk.f32.gmra.mxu0 %vm86_vm1, %v41_v55  ;;  %1342 = vmatmul.mubr.msk.f32.gmra.mxu1 %vm86_vm1, %v73_v56 }
  0x3a   :  { %1296 = vmatprep.mubr.msk.f32.mxu0 %vm86_vm1, %v42_v57  ;;  %1344 = vmatprep.mubr.msk.f32.mxu1 %vm86_vm1, %v74_v58 }
  0x3d   :  { %1297 = vmatmul.mubr.msk.f32.gmra.mxu0 %vm86_vm1, %v43_v59  ;;  %1345 = vmatmul.mubr.msk.f32.gmra.mxu1 %vm86_vm1, %v75_v60 }
  0x3e   :  { %1299 = vmatprep.mubr.msk.f32.mxu0 %vm86_vm1, %v44_v61  ;;  %1347 = vmatprep.mubr.msk.f32.mxu1 %vm86_vm1, %v76_v62 }
  0x41   :  { %1300 = vmatmul.mubr.msk.f32.gmra.mxu0 %vm86_vm1, %v45_v63  ;;  %1348 = vmatmul.mubr.msk.f32.gmra.mxu1 %vm86_vm1, %v77_v0 }
  0xc5   :  { %v1256_v2 = vpop.f32.mrf.mxu0  ;;  %v1304_v3 = vpop.f32.mrf.mxu1 }
  0xc6   :  { %v1894_v4 = vadd.f32 %v1256_v2, %v1891_v1  ;;  %v1897_v5 = vadd.f32 %v1304_v3, %v1891_v1 }
  0xc7   :  { %v349_v6 = vpop.f32.mrf.mxu0  ;;  %v509_v7 = vpop.f32.mrf.mxu1 }
  0xc8   :  { %v669_v8 = vsub.f32 0.0, %v1894_v4  ;;  %v701_v9 = vsub.f32 0.0, %v1897_v5  ;;  %v1902_v10 = vadd.f32 %v1891_v1, %v349_v6  ;;  %v1905_v11 = vadd.f32 %v1891_v1, %v509_v7 }
  0xc9   :  { %v1259_v12 = vpop.f32.mrf.mxu0  ;;  %v1307_v13 = vpop.f32.mrf.mxu1 }
  0xca   :  { %v734_v14 = vmul.f32 1.442695, %v669_v8  ;;  %v798_v15 = vmul.f32 1.442695, %v701_v9  ;;  %v668_v16 = vsub.f32 0.0, %v1902_v10  ;;  %v700_v17 = vsub.f32 0.0, %v1905_v11 }
  0xcb   :  { %v1910_v18 = vadd.f32 %v1259_v12, %v1891_v1  ;;  %v1913_v19 = vadd.f32 %v1307_v13, %v1891_v1  ;;  %v359_v20 = vpop.f32.mrf.mxu0  ;;  %v519_v21 = vpop.f32.mrf.mxu1 }
  0xcc   :  { %1352 = vpow2.f32 %v734_v14  ;;  %v732_v22 = vmul.f32 1.442695, %v668_v16  ;;  %v796_v23 = vmul.f32 1.442695, %v700_v17  ;;  %v1916_v24 = vadd.f32 %v1891_v1, %v359_v20 }
  0xcd   :  { %1354 = vpow2.f32 %v798_v15  ;;  %v671_v25 = vsub.f32 0.0, %v1910_v18  ;;  %v703_v26 = vsub.f32 0.0, %v1913_v19  ;;  %v1921_v27 = vadd.f32 %v1891_v1, %v519_v21  ;;  %v1262_v28 = vpop.f32.mrf.mxu0  ;;  %v1310_v29 = vpop.f32.mrf.mxu1 }
  0xce   :  { %1356 = vpow2.f32 %v732_v22  ;;  %v670_v30 = vsub.f32 0.0, %v1916_v24  ;;  %v1925_v31 = vadd.f32 %v1262_v28, %v1891_v1  ;;  %v1928_v32 = vadd.f32 %v1310_v29, %v1891_v1 }
  0xcf   :  { %1358 = vpow2.f32 %v796_v23  ;;  %v738_v33 = vmul.f32 1.442695, %v671_v25  ;;  %v802_v34 = vmul.f32 1.442695, %v703_v26  ;;  %v702_v35 = vsub.f32 0.0, %v1921_v27  ;;  %v369_v36 = vpop.f32.mrf.mxu0  ;;  %v529_v37 = vpop.f32.mrf.mxu1 }
  0xd0   :  { %v736_v38 = vmul.f32 1.442695, %v670_v30  ;;  %v673_v39 = vsub.f32 0.0, %v1925_v31  ;;  %v705_v40 = vsub.f32 0.0, %v1928_v32  ;;  %v1934_v41 = vadd.f32 %v1891_v1, %v369_v36 }
  0xd1   :  { %1360 = vpow2.f32 %v738_v33  ;;  %v800_v42 = vmul.f32 1.442695, %v702_v35  ;;  %v1937_v43 = vadd.f32 %v1891_v1, %v529_v37  ;;  %v1265_v44 = vpop.f32.mrf.mxu0  ;;  %v1313_v45 = vpop.f32.mrf.mxu1 }
  0xd2   :  { %1362 = vpow2.f32 %v802_v34  ;;  %v742_v46 = vmul.f32 1.442695, %v673_v39  ;;  %v806_v47 = vmul.f32 1.442695, %v705_v40  ;;  %v672_v48 = vsub.f32 0.0, %v1934_v41 }
  0xd3   :  { %1364 = vpow2.f32 %v736_v38  ;;  %v704_v49 = vsub.f32 0.0, %v1937_v43  ;;  %v1942_v50 = vadd.f32 %v1265_v44, %v1891_v1  ;;  %v1945_v51 = vadd.f32 %v1313_v45, %v1891_v1  ;;  %v379_v52 = vpop.f32.mrf.mxu0  ;;  %v539_v53 = vpop.f32.mrf.mxu1 }
  0xd4   :  { %1366 = vpow2.f32 %v800_v42  ;;  %v740_v54 = vmul.f32 1.442695, %v672_v48  ;;  %v1948_v55 = vadd.f32 %v1891_v1, %v379_v52  ;;  %v1951_v56 = vadd.f32 %v1891_v1, %v539_v53 }
  0xd5   :  { %1368 = vpow2.f32 %v742_v46  ;;  %v804_v57 = vmul.f32 1.442695, %v704_v49  ;;  %v675_v58 = vsub.f32 0.0, %v1942_v50  ;;  %v707_v59 = vsub.f32 0.0, %v1945_v51  ;;  %v1268_v60 = vpop.f32.mrf.mxu0  ;;  %v1316_v61 = vpop.f32.mrf.mxu1 }
  0xd6   :  { %1370 = vpow2.f32 %v806_v47  ;;  %v674_v62 = vsub.f32 0.0, %v1948_v55  ;;  %v706_v7 = vsub.f32 0.0, %v1951_v56  ;;  %v1958_v25 = vadd.f32 %v1268_v60, %v1891_v1 }
  0xd7   :  { %1372 = vpow2.f32 %v740_v54  ;;  %v746_v63 = vmul.f32 1.442695, %v675_v58  ;;  %v810_v0 = vmul.f32 1.442695, %v707_v59  ;;  %v389_v2 = vpop.f32.mrf.mxu0  ;;  %v549_v3 = vpop.f32.mrf.mxu1  ;;  %v1961_v28 = vadd.f32 %v1316_v61, %v1891_v1 }
  0xd8   :  { %1374 = vpow2.f32 %v804_v57  ;;  %v744_v6 = vmul.f32 1.442695, %v674_v62  ;;  %v808_v21 = vmul.f32 1.442695, %v706_v7  ;;  %v1964_v33 = vadd.f32 %v1891_v1, %v389_v2 }
  0xd9   :  { %v1353_v8 = vpop.eup %1352  ;;  %1376 = vpow2.f32 %v746_v63  ;;  %v1271_v9 = vpop.f32.mrf.mxu0  ;;  %v1967_v37 = vadd.f32 %v1891_v1, %v549_v3  ;;  %v677_v42 = vsub.f32 0.0, %v1958_v25  ;;  %v709_v47 = vsub.f32 0.0, %v1961_v28 }
  0xda   :  { %v1355_v12 = vpop.eup %1354  ;;  %v861_v13 = vadd.f32 1.0, %v1353_v8  ;;  %1378 = vpow2.f32 %v810_v0  ;;  %v1319_v16 = vpop.f32.mrf.mxu1  ;;  %v1971_v44 = vadd.f32 %v1271_v9, %v1891_v1  ;;  %v676_v53 = vsub.f32 0.0, %v1964_v33 }
  0xdb   :  { %v1357_v14 = vpop.eup %1356  ;;  %v893_v15 = vadd.f32 1.0, %v1355_v12  ;;  %1380 = vpow2.f32 %v744_v6  ;;  %v399_v22 = vpop.f32.mrf.mxu0  ;;  %v1975_v48 = vadd.f32 %v1319_v16, %v1891_v1  ;;  %v708_v59 = vsub.f32 0.0, %v1967_v37 }
  0xdc   :  { %v1359_v17 = vpop.eup %1358  ;;  %1382 = vrcp.f32 %v861_v13  ;;  %v860_v20 = vadd.f32 1.0, %v1357_v14  ;;  %v559_v34 = vpop.f32.mrf.mxu1  ;;  %v1980_v60 = vadd.f32 %v1891_v1, %v399_v22  ;;  %v750_v0 = vmul.f32 1.442695, %v677_v42 }
  0xdd   :  { %1384 = vrcp.f32 %v893_v15  ;;  %v892_v23 = vadd.f32 1.0, %v1359_v17  ;;  %v1274_v38 = vpop.f32.mrf.mxu0  ;;  %v679_v2 = vsub.f32 0.0, %v1971_v44  ;;  %v814_v7 = vmul.f32 1.442695, %v709_v47 }
  0xde   :  { %v1361_v26 = vpop.eup %1360  ;;  %1386 = vrcp.f32 %v860_v20  ;;  %v1322_v54 = vpop.f32.mrf.mxu1  ;;  %v711_v8 = vsub.f32 0.0, %v1975_v48  ;;  %v748_v13 = vmul.f32 1.442695, %v676_v53  ;;  %v1985_v14 = vadd.f32 %v1891_v1, %v559_v34 }
  0xdf   :  { %v1363_v29 = vpop.eup %1362  ;;  %1388 = vrcp.f32 %v892_v23  ;;  %v863_v30 = vadd.f32 1.0, %v1361_v26  ;;  %v409_v61 = vpop.f32.mrf.mxu0  ;;  %v812_v20 = vmul.f32 1.442695, %v708_v59 }
  0xe0   :  { %v1365_v35 = vpop.eup %1364  ;;  %v895_v36 = vadd.f32 1.0, %v1363_v29  ;;  %1390 = vpow2.f32 %v808_v21  ;;  %v569_v15 = vpop.f32.mrf.mxu1  ;;  %v678_v21 = vsub.f32 0.0, %v1980_v60  ;;  %v754_v29 = vmul.f32 1.442695, %v679_v2 }
  0xe1   :  { %v1367_v39 = vpop.eup %1366  ;;  %1392 = vrcp.f32 %v863_v30  ;;  %v862_v40 = vadd.f32 1.0, %v1365_v35  ;;  %v1277_v22 = vpop.f32.mrf.mxu0  ;;  %v1989_v30 = vadd.f32 %v1274_v38, %v1891_v1  ;;  %v818_v34 = vmul.f32 1.442695, %v711_v8 }
  0xe2   :  { %v1369_v45 = vpop.eup %1368  ;;  %1394 = vrcp.f32 %v895_v36  ;;  %v894_v46 = vadd.f32 1.0, %v1367_v39  ;;  %v1993_v39 = vadd.f32 %v1322_v54, %v1891_v1  ;;  %v1325_v47 = vpop.f32.mrf.mxu1 }
  0xe3   :  { %v1371_v49 = vpop.eup %1370  ;;  %1396 = vrcp.f32 %v862_v40  ;;  %v865_v52 = vadd.f32 1.0, %v1369_v45  ;;  %v710_v45 = vsub.f32 0.0, %v1985_v14 }
  0xe4   :  { %v1373_v57 = vpop.eup %1372  ;;  %1398 = vrcp.f32 %v894_v46  ;;  %v897_v58 = vadd.f32 1.0, %v1371_v49  ;;  %v1998_v46 = vadd.f32 %v1891_v1, %v409_v61  ;;  %v752_v49 = vmul.f32 1.442695, %v678_v21 }
  0xe5   :  { %v1375_v62 = vpop.eup %1374  ;;  %1400 = vrcp.f32 %v865_v52  ;;  %v864_v63 = vadd.f32 1.0, %v1373_v57  ;;  %v2006_v52 = vadd.f32 %v1891_v1, %v569_v15  ;;  %v681_v57 = vsub.f32 0.0, %v1989_v30 }
  0xe6   :  { %v1377_v3 = vpop.eup %1376  ;;  %1402 = vrcp.f32 %v897_v58  ;;  %v896_v6 = vadd.f32 1.0, %v1375_v62  ;;  %v2015_v58 = vadd.f32 %v1277_v22, %v1891_v1  ;;  %v713_v61 = vsub.f32 0.0, %v1993_v39 }
  0xe7   :  { %v1379_v9 = vpop.eup %1378  ;;  %1404 = vrcp.f32 %v864_v63  ;;  %v867_v12 = vadd.f32 1.0, %v1377_v3  ;;  %v2023_v62 = vadd.f32 %v1325_v47, %v1891_v1  ;;  %v579_v3 = vpop.f32.mrf.mxu1  ;;  %v816_v8 = vmul.f32 1.442695, %v710_v45 }
  0xe8   :  { %v1381_v16 = vpop.eup %1380  ;;  %1406 = vrcp.f32 %v896_v6  ;;  %v899_v17 = vadd.f32 1.0, %v1379_v9  ;;  %v712_v9 = vsub.f32 0.0, %v2006_v52  ;;  %v758_v15 = vmul.f32 1.442695, %v681_v57 }
  0xe9   :  { %v1383_v23 = vpop.eup %1382  ;;  %1408 = vrcp.f32 %v867_v12  ;;  %v866_v26 = vadd.f32 1.0, %v1381_v16  ;;  %v683_v16 = vsub.f32 0.0, %v2015_v58  ;;  %v715_v21 = vsub.f32 0.0, %v2023_v62 }
  0xea   :  { %v1385_v35 = vpop.eup %1384  ;;  %v989_v36 = vmul.f32 %v1383_v23, %v1894_v4  ;;  %1410 = vrcp.f32 %v899_v17 }
  0xeb   :  { %v1387_v40 = vpop.eup %1386  ;;  %v1021_v42 = vmul.f32 %v1385_v35, %v1897_v5  ;;  %1412 = vrcp.f32 %v866_v26  ;;  %v419_v5 = vpop.f32.mrf.mxu0  ;;  %v762_v45 = vmul.f32 1.442695, %v683_v16 }
  0xec   :  { %v1389_v38 = vpop.eup %1388  ;;  %1054 = vst.msk [vmem:[%s2483_s3 + $0x8] sm:$0xff] %vm1052_vm2, %v989_v36  ;;  %v988_v4 = vmul.f32 %v1387_v40, %v1902_v10  ;;  %1414 = vpow2.f32 %v750_v0  ;;  %v680_v0 = vsub.f32 0.0, %v1998_v46  ;;  %v2032_v2 = vadd.f32 %v1891_v1, %v419_v5 }
  0xed   :  { %v1391_v53 = vpop.eup %1390  ;;  %1086 = vst.msk [vmem:[%s2483_s3 + $0x108] sm:$0xff] %vm1052_vm2, %v1021_v42  ;;  %v1020_v54 = vmul.f32 %v1389_v38, %v1905_v11  ;;  %1416 = vpow2.f32 %v814_v7  ;;  %v2036_v12 = vpop.f32.mrf.mxu0  ;;  %v820_v36 = vmul.f32 1.442695, %v712_v9  ;;  %v826_v38 = vmul.f32 1.442695, %v715_v21 }
  0xee   :  { %v1393_v10 = vpop.eup %1392  ;;  %1053 = vst.msk [vmem:[%s2483_s3] sm:$0xff] %vm1052_vm2, %v988_v4  ;;  %v898_v59 = vadd.f32 1.0, %v1391_v53  ;;  %1418 = vpow2.f32 %v748_v13  ;;  %v756_v23 = vmul.f32 1.442695, %v680_v0  ;;  %v682_v26 = vsub.f32 0.0, %v2032_v2 }
  0xef   :  { %v1395_v11 = vpop.eup %1394  ;;  %1085 = vst.msk [vmem:[%s2483_s3 + $0x100] sm:$0xff] %vm1052_vm2, %v1020_v54  ;;  %v991_v63 = vmul.f32 %v1393_v10, %v1910_v18  ;;  %1420 = vpow2.f32 %v812_v20  ;;  %v822_v20 = vmul.f32 1.442695, %v713_v61  ;;  %v429_v40 = vpop.f32.mrf.mxu0  ;;  %v2100_v9 = vadd.f32 %v2036_v12, %v1891_v1 }
  0xf0   :  { %v1397_v6 = vpop.eup %1396  ;;  %v1023_v7 = vmul.f32 %v1395_v11, %v1913_v19  ;;  %1422 = vrcp.f32 %v898_v59 }
  0xf1   :  { %v1399_v13 = vpop.eup %1398  ;;  %1056 = vst.msk [vmem:[%s2483_s3 + $0x18] sm:$0xff] %vm1052_vm2, %v991_v63  ;;  %v990_v18 = vmul.f32 %v1397_v6, %v1916_v24  ;;  %1424 = vpow2.f32 %v754_v29  ;;  %v1328_v29 = vpop.f32.mrf.mxu1 }
  0xf2   :  { %v1401_v17 = vpop.eup %1400  ;;  %1088 = vst.msk [vmem:[%s2483_s3 + $0x118] sm:$0xff] %vm1052_vm2, %v1023_v7  ;;  %v1022_v19 = vmul.f32 %v1399_v13, %v1921_v27  ;;  %1426 = vpow2.f32 %v818_v34  ;;  %v2062_v34 = vadd.f32 %v1891_v1, %v579_v3  ;;  %v1283_v57 = vpop.f32.mrf.mxu0 }
  0xf3   :  { %v1403_v22 = vpop.eup %1402  ;;  %1055 = vst.msk [vmem:[%s2483_s3 + $0x10] sm:$0xff] %vm1052_vm2, %v990_v18  ;;  %v993_v24 = vmul.f32 %v1401_v17, %v1925_v31  ;;  %1428 = vpow2.f32 %v752_v49  ;;  %v760_v49 = vmul.f32 1.442695, %v682_v26  ;;  %v589_v5 = vpop.f32.mrf.mxu1  ;;  %v685_v26 = vsub.f32 0.0, %v2100_v9 }
  0xf4   :  { %v1405_v35 = vpop.eup %1404  ;;  %1087 = vst.msk [vmem:[%s2483_s3 + $0x110] sm:$0xff] %vm1052_vm2, %v1022_v19  ;;  %v1025_v27 = vmul.f32 %v1403_v22, %v1928_v32  ;;  %1430 = vpow2.f32 %v816_v8  ;;  %v714_v54 = vsub.f32 0.0, %v2062_v34  ;;  %v439_v6 = vpop.f32.mrf.mxu0  ;;  %v2107_v19 = vadd.f32 %v1891_v1, %v429_v40 }
  0xf5   :  { %v1407_v31 = vpop.eup %1406  ;;  %1058 = vst.msk [vmem:[%s2483_s3 + $0x28] sm:$0xff] %vm1052_vm2, %v993_v24  ;;  %v992_v42 = vmul.f32 %v1405_v35, %v1934_v41  ;;  %1432 = vpow2.f32 %v758_v15  ;;  %v1331_v63 = vpop.f32.mrf.mxu1  ;;  %v2104_v15 = vadd.f32 %v1328_v29, %v1891_v1  ;;  %v2118_v29 = vadd.f32 %v1283_v57, %v1891_v1 }
  0xf6   :  { %v1409_v47 = vpop.eup %1408  ;;  %1090 = vst.msk [vmem:[%s2483_s3 + $0x128] sm:$0xff] %vm1052_vm2, %v1025_v27  ;;  %v1024_v32 = vmul.f32 %v1407_v31, %v1937_v43  ;;  %1434 = vpow2.f32 %v822_v20  ;;  %v824_v3 = vmul.f32 1.442695, %v714_v54  ;;  %v1286_v22 = vpop.f32.mrf.mxu0  ;;  %v2122_v40 = vadd.f32 %v1331_v63, %v1891_v1 }
  0xf7   :  { %v1411_v4 = vpop.eup %1410  ;;  %1057 = vst.msk [vmem:[%s2483_s3 + $0x20] sm:$0xff] %vm1052_vm2, %v992_v42  ;;  %v995_v41 = vmul.f32 %v1409_v47, %v1942_v50  ;;  %1436 = vpow2.f32 %v756_v23  ;;  %v599_v20 = vpop.f32.mrf.mxu1  ;;  %v687_v54 = vsub.f32 0.0, %v2118_v29 }
  0xf8   :  { %v1413_v53 = vpop.eup %1412  ;;  %1089 = vst.msk [vmem:[%s2483_s3 + $0x120] sm:$0xff] %vm1052_vm2, %v1024_v32  ;;  %v1027_v43 = vmul.f32 %v1411_v4, %v1945_v51  ;;  %1438 = vpow2.f32 %v820_v36  ;;  %v717_v36 = vsub.f32 0.0, %v2104_v15  ;;  %v2132_v63 = vadd.f32 %v1891_v1, %v599_v20 }
  0xf9   :  { %v1415_v10 = vpop.eup %1414  ;;  %1060 = vst.msk [vmem:[%s2483_s3 + $0x38] sm:$0xff] %vm1052_vm2, %v995_v41  ;;  %v994_v50 = vmul.f32 %v1413_v53, %v1948_v55  ;;  %1440 = vpow2.f32 %v762_v45  ;;  %v684_v45 = vsub.f32 0.0, %v2107_v19  ;;  %v1334_v47 = vpop.f32.mrf.mxu1  ;;  %v2127_v41 = vadd.f32 %v1891_v1, %v439_v6 }
  0xfa   :  { %v1417_v59 = vpop.eup %1416  ;;  %1092 = vst.msk [vmem:[%s2483_s3 + $0x138] sm:$0xff] %vm1052_vm2, %v1027_v43  ;;  %v869_v51 = vadd.f32 1.0, %v1415_v10  ;;  %1442 = vpow2.f32 %v826_v38  ;;  %v766_v43 = vmul.f32 1.442695, %v685_v26 }
  0xfb   :  { %v1419_v61 = vpop.eup %1418  ;;  %1059 = vst.msk [vmem:[%s2483_s3 + $0x30] sm:$0xff] %vm1052_vm2, %v994_v50  ;;  %v901_v11 = vadd.f32 1.0, %v1417_v59  ;;  %1444 = vpow2.f32 %v760_v49  ;;  %v449_v49 = vpop.f32.mrf.mxu0  ;;  %v830_v50 = vmul.f32 1.442695, %v717_v36  ;;  %v719_v59 = vsub.f32 0.0, %v2122_v40 }
  0xfc   :  { %v1421_v0 = vpop.eup %1420  ;;  %1446 = vrcp.f32 %v869_v51  ;;  %v868_v55 = vadd.f32 1.0, %v1419_v61 }
  0xfd   :  { %v1423_v7 = vpop.eup %1422  ;;  %1448 = vrcp.f32 %v901_v11  ;;  %v900_v8 = vadd.f32 1.0, %v1421_v0  ;;  %v764_v11 = vmul.f32 1.442695, %v684_v45  ;;  %v609_v0 = vpop.f32.mrf.mxu1  ;;  %v834_v20 = vmul.f32 1.442695, %v719_v59 }
  0xfe   :  { %v1425_v13 = vpop.eup %1424  ;;  %v1026_v18 = vmul.f32 %v1423_v7, %v1951_v56  ;;  %1450 = vrcp.f32 %v868_v55  ;;  %v2114_v56 = vadd.f32 %v1891_v1, %v589_v5  ;;  %v686_v7 = vsub.f32 0.0, %v2127_v41 }
  0xff   :  { %v1427_v16 = vpop.eup %1426  ;;  %1452 = vrcp.f32 %v900_v8  ;;  %v871_v17 = vadd.f32 1.0, %v1425_v13  ;;  %v1289_v8 = vpop.f32.mrf.mxu0 }
 0x100   :  { %v1429_v21 = vpop.eup %1428  ;;  %1091 = vst.msk [vmem:[%s2483_s3 + $0x130] sm:$0xff] %vm1052_vm2, %v1026_v18  ;;  %v903_v12 = vadd.f32 1.0, %v1427_v16  ;;  %1454 = vpow2.f32 %v824_v3  ;;  %v716_v4 = vsub.f32 0.0, %v2114_v56  ;;  %v770_v16 = vmul.f32 1.442695, %v687_v54  ;;  %v1337_v36 = vpop.f32.mrf.mxu1 }
 0x101   :  { %v1431_v24 = vpop.eup %1430  ;;  %1456 = vrcp.f32 %v871_v17  ;;  %v870_v23 = vadd.f32 1.0, %v1429_v21  ;;  %v2136_v17 = vadd.f32 %v1286_v22, %v1891_v1 }
 0x102   :  { %v1433_v35 = vpop.eup %1432  ;;  %1458 = vrcp.f32 %v903_v12  ;;  %v902_v27 = vadd.f32 1.0, %v1431_v24  ;;  %v828_v6 = vmul.f32 1.442695, %v716_v4  ;;  %v2140_v24 = vadd.f32 %v1334_v47, %v1891_v1 }
 0x103   :  { %v1435_v31 = vpop.eup %1434  ;;  %1460 = vrcp.f32 %v870_v23  ;;  %v873_v42 = vadd.f32 1.0, %v1433_v35  ;;  %v718_v35 = vsub.f32 0.0, %v2132_v63 }
 0x104   :  { %v1437_v32 = vpop.eup %1436  ;;  %1462 = vrcp.f32 %v902_v27  ;;  %v905_v38 = vadd.f32 1.0, %v1435_v31  ;;  %v2145_v27 = vadd.f32 %v1891_v1, %v449_v49  ;;  %v768_v31 = vmul.f32 1.442695, %v686_v7 }
 0x105   :  { %v1439_v5 = vpop.eup %1438  ;;  %1464 = vrcp.f32 %v873_v42  ;;  %v872_v53 = vadd.f32 1.0, %v1437_v32  ;;  %v2153_v42 = vadd.f32 %v1891_v1, %v609_v0  ;;  %v689_v32 = vsub.f32 0.0, %v2136_v17 }
 0x106   :  { %v1441_v57 = vpop.eup %1440  ;;  %1466 = vrcp.f32 %v905_v38  ;;  %v904_v10 = vadd.f32 1.0, %v1439_v5  ;;  %v2162_v38 = vadd.f32 %v1289_v8, %v1891_v1  ;;  %v721_v49 = vsub.f32 0.0, %v2140_v24 }
 0x107   :  { %v1443_v51 = vpop.eup %1442  ;;  %1468 = vrcp.f32 %v872_v53  ;;  %v875_v61 = vadd.f32 1.0, %v1441_v57  ;;  %v2170_v5 = vadd.f32 %v1337_v36, %v1891_v1  ;;  %v619_v57 = vpop.f32.mrf.mxu1  ;;  %v832_v59 = vmul.f32 1.442695, %v718_v35 }
 0x108   :  { %v1445_v55 = vpop.eup %1444  ;;  %1470 = vrcp.f32 %v904_v10  ;;  %v907_v3 = vadd.f32 1.0, %v1443_v51  ;;  %v720_v51 = vsub.f32 0.0, %v2153_v42  ;;  %v774_v0 = vmul.f32 1.442695, %v689_v32 }
 0x109   :  { %v1447_v13 = vpop.eup %1446  ;;  %1472 = vrcp.f32 %v875_v61  ;;  %v874_v18 = vadd.f32 1.0, %v1445_v55  ;;  %v691_v55 = vsub.f32 0.0, %v2162_v38  ;;  %v723_v7 = vsub.f32 0.0, %v2170_v5 }
 0x10a   :  { %v1449_v21 = vpop.eup %1448  ;;  %v997_v12 = vmul.f32 %v1447_v13, %v1958_v25  ;;  %1474 = vrcp.f32 %v907_v3 }
 0x10b   :  { %v1451_v23 = vpop.eup %1450  ;;  %v1029_v26 = vmul.f32 %v1449_v21, %v1961_v28  ;;  %1476 = vrcp.f32 %v874_v18  ;;  %v459_v28 = vpop.f32.mrf.mxu0  ;;  %v778_v35 = vmul.f32 1.442695, %v691_v55 }
 0x10c   :  { %v1453_v22 = vpop.eup %1452  ;;  %1062 = vst.msk [vmem:[%s2483_s3 + $0x48] sm:$0xff] %vm1052_vm2, %v997_v12  ;;  %v996_v25 = vmul.f32 %v1451_v23, %v1964_v33  ;;  %1478 = vpow2.f32 %v766_v43  ;;  %v688_v43 = vsub.f32 0.0, %v2145_v27  ;;  %v2179_v54 = vadd.f32 %v1891_v1, %v459_v28 }
 0x10d   :  { %v1455_v45 = vpop.eup %1454  ;;  %1094 = vst.msk [vmem:[%s2483_s3 + $0x148] sm:$0xff] %vm1052_vm2, %v1029_v26  ;;  %v1028_v47 = vmul.f32 %v1453_v22, %v1967_v37  ;;  %1480 = vpow2.f32 %v830_v50  ;;  %v2183_v61 = vpop.f32.mrf.mxu0  ;;  %v836_v12 = vmul.f32 1.442695, %v720_v51  ;;  %v842_v22 = vmul.f32 1.442695, %v723_v7 }
 0x10e   :  { %v1457_v33 = vpop.eup %1456  ;;  %1061 = vst.msk [vmem:[%s2483_s3 + $0x40] sm:$0xff] %vm1052_vm2, %v996_v25  ;;  %v906_v4 = vadd.f32 1.0, %v1455_v45  ;;  %1482 = vpow2.f32 %v764_v11  ;;  %v772_v13 = vmul.f32 1.442695, %v688_v43  ;;  %v690_v18 = vsub.f32 0.0, %v2179_v54 }
 0x10f   :  { %v1459_v37 = vpop.eup %1458  ;;  %1093 = vst.msk [vmem:[%s2483_s3 + $0x140] sm:$0xff] %vm1052_vm2, %v1028_v47  ;;  %v999_v53 = vmul.f32 %v1457_v33, %v1971_v44  ;;  %1484 = vpow2.f32 %v828_v6  ;;  %v838_v6 = vmul.f32 1.442695, %v721_v49  ;;  %v469_v23 = vpop.f32.mrf.mxu0  ;;  %v2247_v51 = vadd.f32 %v2183_v61, %v1891_v1 }
 0x110   :  { %v1461_v10 = vpop.eup %1460  ;;  %v1031_v50 = vmul.f32 %v1459_v37, %v1975_v48  ;;  %1486 = vrcp.f32 %v906_v4 }
 0x111   :  { %v1463_v11 = vpop.eup %1462  ;;  %1064 = vst.msk [vmem:[%s2483_s3 + $0x58] sm:$0xff] %vm1052_vm2, %v999_v53  ;;  %v998_v44 = vmul.f32 %v1461_v10, %v1980_v60  ;;  %1488 = vpow2.f32 %v770_v16  ;;  %v1340_v16 = vpop.f32.mrf.mxu1 }
 0x112   :  { %v1465_v3 = vpop.eup %1464  ;;  %1096 = vst.msk [vmem:[%s2483_s3 + $0x158] sm:$0xff] %vm1052_vm2, %v1031_v50  ;;  %v1030_v48 = vmul.f32 %v1463_v11, %v1985_v14  ;;  %1490 = vpow2.f32 %v834_v20  ;;  %v2209_v20 = vadd.f32 %v1891_v1, %v619_v57  ;;  %v1295_v32 = vpop.f32.mrf.mxu0 }
 0x113   :  { %v1467_v8 = vpop.eup %1466  ;;  %1063 = vst.msk [vmem:[%s2483_s3 + $0x50] sm:$0xff] %vm1052_vm2, %v998_v44  ;;  %v1001_v60 = vmul.f32 %v1465_v3, %v1989_v30  ;;  %1492 = vpow2.f32 %v768_v31  ;;  %v776_v31 = vmul.f32 1.442695, %v690_v18  ;;  %v629_v28 = vpop.f32.mrf.mxu1  ;;  %v693_v18 = vsub.f32 0.0, %v2247_v51 }
 0x114   :  { %v1469_v21 = vpop.eup %1468  ;;  %1095 = vst.msk [vmem:[%s2483_s3 + $0x150] sm:$0xff] %vm1052_vm2, %v1030_v48  ;;  %v1033_v14 = vmul.f32 %v1467_v8, %v1993_v39  ;;  %1494 = vpow2.f32 %v832_v59  ;;  %v722_v47 = vsub.f32 0.0, %v2209_v20  ;;  %v479_v10 = vpop.f32.mrf.mxu0  ;;  %v2254_v48 = vadd.f32 %v1891_v1, %v469_v23 }
 0x115   :  { %v1471_v30 = vpop.eup %1470  ;;  %1066 = vst.msk [vmem:[%s2483_s3 + $0x68] sm:$0xff] %vm1052_vm2, %v1001_v60  ;;  %v1000_v26 = vmul.f32 %v1469_v21, %v1998_v46  ;;  %1496 = vpow2.f32 %v774_v0  ;;  %v1343_v53 = vpop.f32.mrf.mxu1  ;;  %v2251_v0 = vadd.f32 %v1340_v16, %v1891_v1  ;;  %v2265_v16 = vadd.f32 %v1295_v32, %v1891_v1 }
 0x116   :  { %v1473_v36 = vpop.eup %1472  ;;  %1098 = vst.msk [vmem:[%s2483_s3 + $0x168] sm:$0xff] %vm1052_vm2, %v1033_v14  ;;  %v1032_v39 = vmul.f32 %v1471_v30, %v2006_v52  ;;  %1498 = vpow2.f32 %v838_v6  ;;  %v840_v57 = vmul.f32 1.442695, %v722_v47  ;;  %v1298_v8 = vpop.f32.mrf.mxu0  ;;  %v2269_v23 = vadd.f32 %v1343_v53, %v1891_v1 }
 0x117   :  { %v1475_v25 = vpop.eup %1474  ;;  %1065 = vst.msk [vmem:[%s2483_s3 + $0x60] sm:$0xff] %vm1052_vm2, %v1000_v26  ;;  %v1003_v46 = vmul.f32 %v1473_v36, %v2015_v58  ;;  %1500 = vpow2.f32 %v772_v13  ;;  %v639_v6 = vpop.f32.mrf.mxu1  ;;  %v695_v47 = vsub.f32 0.0, %v2265_v16 }
 0x118   :  { %v1477_v45 = vpop.eup %1476  ;;  %1097 = vst.msk [vmem:[%s2483_s3 + $0x160] sm:$0xff] %vm1052_vm2, %v1032_v39  ;;  %v1035_v52 = vmul.f32 %v1475_v25, %v2023_v62  ;;  %1502 = vpow2.f32 %v836_v12  ;;  %v725_v12 = vsub.f32 0.0, %v2251_v0  ;;  %v2279_v53 = vadd.f32 %v1891_v1, %v639_v6 }
 0x119   :  { %v1479_v33 = vpop.eup %1478  ;;  %1068 = vst.msk [vmem:[%s2483_s3 + $0x78] sm:$0xff] %vm1052_vm2, %v1003_v46  ;;  %v1002_v58 = vmul.f32 %v1477_v45, %v2032_v2  ;;  %1504 = vpow2.f32 %v778_v35  ;;  %v692_v35 = vsub.f32 0.0, %v2254_v48  ;;  %v1346_v36 = vpop.f32.mrf.mxu1  ;;  %v2274_v46 = vadd.f32 %v1891_v1, %v479_v10 }
 0x11a   :  { %v1481_v4 = vpop.eup %1480  ;;  %1100 = vst.msk [vmem:[%s2483_s3 + $0x178] sm:$0xff] %vm1052_vm2, %v1035_v52  ;;  %v877_v62 = vadd.f32 1.0, %v1479_v33  ;;  %1506 = vpow2.f32 %v842_v22  ;;  %v782_v52 = vmul.f32 1.442695, %v693_v18 }
 0x11b   :  { %v1483_v49 = vpop.eup %1482  ;;  %1067 = vst.msk [vmem:[%s2483_s3 + $0x70] sm:$0xff] %vm1052_vm2, %v1002_v58  ;;  %v909_v37 = vadd.f32 1.0, %v1481_v4  ;;  %1508 = vpow2.f32 %v776_v31  ;;  %v489_v31 = vpop.f32.mrf.mxu0  ;;  %v846_v58 = vmul.f32 1.442695, %v725_v12  ;;  %v727_v4 = vsub.f32 0.0, %v2269_v23 }
 0x11c   :  { %v1485_v43 = vpop.eup %1484  ;;  %1510 = vrcp.f32 %v877_v62  ;;  %v876_v2 = vadd.f32 1.0, %v1483_v49 }
 0x11d   :  { %v1487_v50 = vpop.eup %1486  ;;  %1512 = vrcp.f32 %v909_v37  ;;  %v908_v59 = vadd.f32 1.0, %v1485_v43  ;;  %v780_v37 = vmul.f32 1.442695, %v692_v35  ;;  %v649_v43 = vpop.f32.mrf.mxu1 }
 0x11e   :  { %v1489_v11 = vpop.eup %1488  ;;  %v1034_v44 = vmul.f32 %v1487_v50, %v2062_v34  ;;  %1514 = vrcp.f32 %v876_v2  ;;  %v2261_v34 = vadd.f32 %v1891_v1, %v629_v28  ;;  %v694_v50 = vsub.f32 0.0, %v2274_v46 }
 0x11f   :  { %v1491_v55 = vpop.eup %1490  ;;  %1516 = vrcp.f32 %v908_v59  ;;  %v879_v3 = vadd.f32 1.0, %v1489_v11  ;;  %v1301_v59 = vpop.f32.mrf.mxu0 }
 0x120   :  { %v1493_v7 = vpop.eup %1492  ;;  %1099 = vst.msk [vmem:[%s2483_s3 + $0x170] sm:$0xff] %vm1052_vm2, %v1034_v44  ;;  %v911_v61 = vadd.f32 1.0, %v1491_v55  ;;  %1518 = vpow2.f32 %v840_v57  ;;  %v724_v25 = vsub.f32 0.0, %v2261_v34  ;;  %v786_v55 = vmul.f32 1.442695, %v695_v47  ;;  %v1349_v12 = vpop.f32.mrf.mxu1 }
 0x121   :  { %v1495_v60 = vpop.eup %1494  ;;  %1520 = vrcp.f32 %v879_v3  ;;  %v878_v13 = vadd.f32 1.0, %v1493_v7  ;;  %v2285_v3 = vld [vmem:[%s2482_s2] ss:$0 sm:$0xff] }
 0x122   :  { %v1497_v21 = vpop.eup %1496  ;;  %1522 = vrcp.f32 %v911_v61  ;;  %v910_v14 = vadd.f32 1.0, %v1495_v60  ;;  %v844_v10 = vmul.f32 1.442695, %v724_v25  ;;  %v2288_v1 = vadd.f32 %v2285_v3, %v1298_v8 }
 0x123   :  { %v1499_v30 = vpop.eup %1498  ;;  %1524 = vrcp.f32 %v878_v13  ;;  %v881_v26 = vadd.f32 1.0, %v1497_v21  ;;  %v850_v61 = vmul.f32 1.442695, %v727_v4  ;;  %v2292_v60 = vadd.f32 %v2285_v3, %v1346_v36 }
 0x124   :  { %v1501_v39 = vpop.eup %1500  ;;  %1526 = vrcp.f32 %v910_v14  ;;  %v913_v22 = vadd.f32 1.0, %v1499_v30  ;;  %v726_v21 = vsub.f32 0.0, %v2279_v53  ;;  %v2297_v14 = vadd.f32 %v2285_v3, %v489_v31 }
 0x125   :  { %v1503_v28 = vpop.eup %1502  ;;  %1528 = vrcp.f32 %v881_v26  ;;  %v880_v45 = vadd.f32 1.0, %v1501_v39  ;;  %v784_v30 = vmul.f32 1.442695, %v694_v50  ;;  %v2305_v26 = vadd.f32 %v2285_v3, %v649_v43  ;;  %v659_v43 = vpop.f32.mrf.mxu1 }
 0x126   :  { %v1505_v32 = vpop.eup %1504  ;;  %1530 = vrcp.f32 %v913_v22  ;;  %v912_v33 = vadd.f32 1.0, %v1503_v28  ;;  %v697_v39 = vsub.f32 0.0, %v2288_v1  ;;  %v2314_v22 = vadd.f32 %v2285_v3, %v1301_v59 }
 0x127   :  { %v1507_v62 = vpop.eup %1506  ;;  %1532 = vrcp.f32 %v880_v45  ;;  %v883_v49 = vadd.f32 1.0, %v1505_v32  ;;  %v729_v31 = vsub.f32 0.0, %v2292_v60  ;;  %v2322_v28 = vadd.f32 %v2285_v3, %v1349_v12 }
 0x128   :  { %v1509_v2 = vpop.eup %1508  ;;  %1534 = vrcp.f32 %v912_v33  ;;  %v915_v57 = vadd.f32 1.0, %v1507_v62  ;;  %v728_v4 = vsub.f32 0.0, %v2305_v26 }
 0x129   :  { %v1511_v11 = vpop.eup %1510  ;;  %1536 = vrcp.f32 %v883_v49  ;;  %v882_v44 = vadd.f32 1.0, %v1509_v2  ;;  %v790_v49 = vmul.f32 1.442695, %v697_v39 }
 0x12a   :  { %v1513_v6 = vpop.eup %1512  ;;  %v1005_v7 = vmul.f32 %v1511_v11, %v2100_v9  ;;  %1538 = vrcp.f32 %v915_v57  ;;  %v854_v57 = vmul.f32 1.442695, %v729_v31 }
 0x12b   :  { %v1515_v13 = vpop.eup %1514  ;;  %v1037_v18 = vmul.f32 %v1513_v6, %v2104_v15  ;;  %1540 = vrcp.f32 %v882_v44  ;;  %v499_v15 = vpop.f32.mrf.mxu0  ;;  %v2359_v6 = vadd.f32 %v2285_v3, %v659_v43 }
 0x12c   :  { %v1517_v8 = vpop.eup %1516  ;;  %1070 = vst.msk [vmem:[%s2483_s3 + $0x88] sm:$0xff] %vm1052_vm2, %v1005_v7  ;;  %v1004_v9 = vmul.f32 %v1515_v13, %v2107_v19  ;;  %1542 = vpow2.f32 %v782_v52  ;;  %v696_v52 = vsub.f32 0.0, %v2297_v14  ;;  %v2331_v47 = vadd.f32 %v2285_v3, %v499_v15 }
 0x12d   :  { %v1519_v35 = vpop.eup %1518  ;;  %1102 = vst.msk [vmem:[%s2483_s3 + $0x188] sm:$0xff] %vm1052_vm2, %v1037_v18  ;;  %v1036_v36 = vmul.f32 %v1517_v8, %v2114_v56  ;;  %1544 = vpow2.f32 %v846_v58  ;;  %v848_v58 = vmul.f32 1.442695, %v726_v21  ;;  %v730_v8 = vsub.f32 0.0, %v2359_v6 }
 0x12e   :  { %v1521_v19 = vpop.eup %1520  ;;  %1069 = vst.msk [vmem:[%s2483_s3 + $0x80] sm:$0xff] %vm1052_vm2, %v1004_v9  ;;  %v914_v25 = vadd.f32 1.0, %v1519_v35  ;;  %1546 = vpow2.f32 %v780_v37  ;;  %v699_v37 = vsub.f32 0.0, %v2314_v22  ;;  %v788_v59 = vmul.f32 1.442695, %v696_v52 }
 0x12f   :  { %v1523_v56 = vpop.eup %1522  ;;  %1101 = vst.msk [vmem:[%s2483_s3 + $0x180] sm:$0xff] %vm1052_vm2, %v1036_v36  ;;  %v1007_v45 = vmul.f32 %v1521_v19, %v2118_v29  ;;  %1548 = vpow2.f32 %v844_v10  ;;  %v731_v10 = vsub.f32 0.0, %v2322_v28  ;;  %v698_v11 = vsub.f32 0.0, %v2331_v47 }
 0x130   :  { %v1525_v32 = vpop.eup %1524  ;;  %v1039_v33 = vmul.f32 %v1523_v56, %v2122_v40  ;;  %1550 = vrcp.f32 %v914_v25  ;;  %v856_v39 = vmul.f32 1.442695, %v730_v8 }
 0x131   :  { %v1527_v62 = vpop.eup %1526  ;;  %1072 = vst.msk [vmem:[%s2483_s3 + $0x98] sm:$0xff] %vm1052_vm2, %v1007_v45  ;;  %v1006_v29 = vmul.f32 %v1525_v32, %v2127_v41  ;;  %1552 = vpow2.f32 %v786_v55  ;;  %v852_v55 = vmul.f32 1.442695, %v728_v4  ;;  %v858_v3 = vmul.f32 1.442695, %v731_v10 }
 0x132   :  { %v1529_v2 = vpop.eup %1528  ;;  %1104 = vst.msk [vmem:[%s2483_s3 + $0x198] sm:$0xff] %vm1052_vm2, %v1039_v33  ;;  %v1038_v40 = vmul.f32 %v1527_v62, %v2132_v63  ;;  %1554 = vpow2.f32 %v850_v61  ;;  %v794_v61 = vmul.f32 1.442695, %v699_v37  ;;  %v792_v21 = vmul.f32 1.442695, %v698_v11 }
 0x133   :  { %v1531_v50 = vpop.eup %1530  ;;  %1071 = vst.msk [vmem:[%s2483_s3 + $0x90] sm:$0xff] %vm1052_vm2, %v1006_v29  ;;  %v1009_v41 = vmul.f32 %v1529_v2, %v2136_v17  ;;  %1556 = vpow2.f32 %v784_v30 }
 0x134   :  { %v1533_v44 = vpop.eup %1532  ;;  %1103 = vst.msk [vmem:[%s2483_s3 + $0x190] sm:$0xff] %vm1052_vm2, %v1038_v40  ;;  %v1041_v63 = vmul.f32 %v1531_v50, %v2140_v24  ;;  %1558 = vpow2.f32 %v848_v58 }
 0x135   :  { %v1535_v7 = vpop.eup %1534  ;;  %1074 = vst.msk [vmem:[%s2483_s3 + $0xa8] sm:$0xff] %vm1052_vm2, %v1009_v41  ;;  %v1008_v17 = vmul.f32 %v1533_v44, %v2145_v27  ;;  %1560 = vpow2.f32 %v790_v49 }
 0x136   :  { %v1537_v13 = vpop.eup %1536  ;;  %1106 = vst.msk [vmem:[%s2483_s3 + $0x1a8] sm:$0xff] %vm1052_vm2, %v1041_v63  ;;  %v1040_v24 = vmul.f32 %v1535_v7, %v2153_v42  ;;  %1562 = vpow2.f32 %v854_v57 }
 0x137   :  { %v1539_v18 = vpop.eup %1538  ;;  %1073 = vst.msk [vmem:[%s2483_s3 + $0xa0] sm:$0xff] %vm1052_vm2, %v1008_v17  ;;  %v1011_v27 = vmul.f32 %v1537_v13, %v2162_v38  ;;  %1564 = vpow2.f32 %v788_v59 }
 0x138   :  { %v1541_v12 = vpop.eup %1540  ;;  %1105 = vst.msk [vmem:[%s2483_s3 + $0x1a0] sm:$0xff] %vm1052_vm2, %v1040_v24  ;;  %v1043_v42 = vmul.f32 %v1539_v18, %v2170_v5  ;;  %1566 = vpow2.f32 %v852_v55 }
 0x139   :  { %v1543_v9 = vpop.eup %1542  ;;  %1076 = vst.msk [vmem:[%s2483_s3 + $0xb8] sm:$0xff] %vm1052_vm2, %v1011_v27  ;;  %v1010_v38 = vmul.f32 %v1541_v12, %v2179_v54  ;;  %1568 = vpow2.f32 %v794_v61 }
 0x13a   :  { %v1545_v30 = vpop.eup %1544  ;;  %1108 = vst.msk [vmem:[%s2483_s3 + $0x1b8] sm:$0xff] %vm1052_vm2, %v1043_v42  ;;  %v885_v15 = vadd.f32 1.0, %v1543_v9  ;;  %1570 = vpow2.f32 %v858_v3 }
 0x13b   :  { %v1547_v5 = vpop.eup %1546  ;;  %1075 = vst.msk [vmem:[%s2483_s3 + $0xb0] sm:$0xff] %vm1052_vm2, %v1010_v38  ;;  %v917_v35 = vadd.f32 1.0, %v1545_v30  ;;  %1572 = vpow2.f32 %v792_v21 }
 0x13c   :  { %v1549_v36 = vpop.eup %1548  ;;  %1574 = vrcp.f32 %v885_v15  ;;  %v884_v54 = vadd.f32 1.0, %v1547_v5 }
 0x13d   :  { %v1551_v19 = vpop.eup %1550  ;;  %1576 = vrcp.f32 %v917_v35  ;;  %v916_v25 = vadd.f32 1.0, %v1549_v36 }
 0x13e   :  { %v1553_v31 = vpop.eup %1552  ;;  %v1042_v56 = vmul.f32 %v1551_v19, %v2209_v20  ;;  %1578 = vrcp.f32 %v884_v54 }
 0x13f   :  { %v1555_v45 = vpop.eup %1554  ;;  %1580 = vrcp.f32 %v916_v25  ;;  %v887_v52 = vadd.f32 1.0, %v1553_v31 }
 0x140   :  { %v1557_v32 = vpop.eup %1556  ;;  %1107 = vst.msk [vmem:[%s2483_s3 + $0x1b0] sm:$0xff] %vm1052_vm2, %v1042_v56  ;;  %v919_v33 = vadd.f32 1.0, %v1555_v45  ;;  %1582 = vpow2.f32 %v856_v39 }
 0x141   :  { %v1559_v58 = vpop.eup %1558  ;;  %1584 = vrcp.f32 %v887_v52  ;;  %v886_v4 = vadd.f32 1.0, %v1557_v32 }
 0x142   :  { %v1561_v62 = vpop.eup %1560  ;;  %1586 = vrcp.f32 %v919_v33  ;;  %v918_v29 = vadd.f32 1.0, %v1559_v58 }
 0x143   :  { %v1563_v49 = vpop.eup %1562  ;;  %1588 = vrcp.f32 %v886_v4  ;;  %v889_v20 = vadd.f32 1.0, %v1561_v62 }
 0x144   :  { %v1565_v37 = vpop.eup %1564  ;;  %1590 = vrcp.f32 %v918_v29  ;;  %v921_v43 = vadd.f32 1.0, %v1563_v49 }
 0x145   :  { %v1567_v2 = vpop.eup %1566  ;;  %1592 = vrcp.f32 %v889_v20  ;;  %v888_v40 = vadd.f32 1.0, %v1565_v37 }
 0x146   :  { %v1569_v57 = vpop.eup %1568  ;;  %1594 = vrcp.f32 %v921_v43  ;;  %v920_v10 = vadd.f32 1.0, %v1567_v2 }
 0x147   :  { %v1571_v50 = vpop.eup %1570  ;;  %1596 = vrcp.f32 %v888_v40  ;;  %v891_v41 = vadd.f32 1.0, %v1569_v57 }
 0x148   :  { %v1573_v59 = vpop.eup %1572  ;;  %1598 = vrcp.f32 %v920_v10  ;;  %v923_v11 = vadd.f32 1.0, %v1571_v50 }
 0x149   :  { %v1575_v44 = vpop.eup %1574  ;;  %1600 = vrcp.f32 %v891_v41  ;;  %v890_v63 = vadd.f32 1.0, %v1573_v59 }
 0x14a   :  { %v1577_v55 = vpop.eup %1576  ;;  %v1013_v7 = vmul.f32 %v1575_v44, %v2247_v51  ;;  %1602 = vrcp.f32 %v923_v11 }
 0x14b   :  { %v1579_v17 = vpop.eup %1578  ;;  %v1045_v61 = vmul.f32 %v1577_v55, %v2251_v0  ;;  %1604 = vrcp.f32 %v890_v63 }
 0x14c   :  { %v1581_v13 = vpop.eup %1580  ;;  %1078 = vst.msk [vmem:[%s2483_s3 + $0xc8] sm:$0xff] %vm1052_vm2, %v1013_v7  ;;  %v1012_v24 = vmul.f32 %v1579_v17, %v2254_v48 }
 0x14d   :  { %v1583_v3 = vpop.eup %1582  ;;  %1110 = vst.msk [vmem:[%s2483_s3 + $0x1c8] sm:$0xff] %vm1052_vm2, %v1045_v61  ;;  %v1044_v51 = vmul.f32 %v1581_v13, %v2261_v34 }
 0x14e   :  { %v1585_v18 = vpop.eup %1584  ;;  %1077 = vst.msk [vmem:[%s2483_s3 + $0xc0] sm:$0xff] %vm1052_vm2, %v1012_v24  ;;  %v922_v0 = vadd.f32 1.0, %v1583_v3 }
 0x14f   :  { %v1587_v27 = vpop.eup %1586  ;;  %1109 = vst.msk [vmem:[%s2483_s3 + $0x1c0] sm:$0xff] %vm1052_vm2, %v1044_v51  ;;  %v1015_v48 = vmul.f32 %v1585_v18, %v2265_v16 }
 0x150   :  { %v1589_v21 = vpop.eup %1588  ;;  %v1047_v12 = vmul.f32 %v1587_v27, %v2269_v23  ;;  %1606 = vrcp.f32 %v922_v0 }
 0x151   :  { %v1591_v34 = vpop.eup %1590  ;;  %1080 = vst.msk [vmem:[%s2483_s3 + $0xd8] sm:$0xff] %vm1052_vm2, %v1015_v48  ;;  %v1014_v42 = vmul.f32 %v1589_v21, %v2274_v46 }
 0x152   :  { %v1593_v8 = vpop.eup %1592  ;;  %1112 = vst.msk [vmem:[%s2483_s3 + $0x1d8] sm:$0xff] %vm1052_vm2, %v1047_v12  ;;  %v1046_v16 = vmul.f32 %v1591_v34, %v2279_v53 }
 0x153   :  { %v1595_v9 = vpop.eup %1594  ;;  %1079 = vst.msk [vmem:[%s2483_s3 + $0xd0] sm:$0xff] %vm1052_vm2, %v1014_v42  ;;  %v1017_v23 = vmul.f32 %v1593_v8, %v2288_v1 }
 0x154   :  { %v1597_v38 = vpop.eup %1596  ;;  %1111 = vst.msk [vmem:[%s2483_s3 + $0x1d0] sm:$0xff] %vm1052_vm2, %v1046_v16  ;;  %v1049_v46 = vmul.f32 %v1595_v9, %v2292_v60 }
 0x155   :  { %v1599_v30 = vpop.eup %1598  ;;  %1082 = vst.msk [vmem:[%s2483_s3 + $0xe8] sm:$0xff] %vm1052_vm2, %v1017_v23  ;;  %v1016_v53 = vmul.f32 %v1597_v38, %v2297_v14 }
 0x156   :  { %v1601_v15 = vpop.eup %1600  ;;  %1114 = vst.msk [vmem:[%s2483_s3 + $0x1e8] sm:$0xff] %vm1052_vm2, %v1049_v46  ;;  %v1048_v1 = vmul.f32 %v1599_v30, %v2305_v26 }
 0x157   :  { %v1603_v5 = vpop.eup %1602  ;;  %1081 = vst.msk [vmem:[%s2483_s3 + $0xe0] sm:$0xff] %vm1052_vm2, %v1016_v53  ;;  %v1019_v60 = vmul.f32 %v1601_v15, %v2314_v22 }
 0x158   :  { %v1605_v35 = vpop.eup %1604  ;;  %1113 = vst.msk [vmem:[%s2483_s3 + $0x1e0] sm:$0xff] %vm1052_vm2, %v1048_v1  ;;  %v1051_v14 = vmul.f32 %v1603_v5, %v2322_v28 }
 0x159   :  { %1084 = vst.msk [vmem:[%s2483_s3 + $0xf8] sm:$0xff] %vm1052_vm2, %v1019_v60  ;;  %v1018_v26 = vmul.f32 %v1605_v35, %v2331_v47 }
 0x15a   :  { %1116 = vst.msk [vmem:[%s2483_s3 + $0x1f8] sm:$0xff] %vm1052_vm2, %v1051_v14 }
 0x15b   :  { %1083 = vst.msk [vmem:[%s2483_s3 + $0xf0] sm:$0xff] %vm1052_vm2, %v1018_v26 }
 0x15d   :  { %v1607_v22 = vpop.eup %1606 }
 0x15e   :  { %v1050_v28 = vmul.f32 %v1607_v22, %v2359_v6 }
 0x160   :  { %1115 = vst.msk [vmem:[%s2483_s3 + $0x1f0] sm:$0xff] %vm1052_vm2, %v1050_v28 }

</bundles_post_ra>
